<compile_context>
chip_gen: v5e
topology: v5e:2x2
jax: 0.10.0
libtpu: 0.0.40
codegen_flags: <defaults>
</compile_context>

<pallas_src>
import functools

import jax
import jax.numpy as jnp
from jax.experimental import pallas as pl
from jax.experimental.pallas import tpu as pltpu


# ---------------------------------------------------------------------------
# Kernels
# ---------------------------------------------------------------------------
def _linear_kernel_kacc(x_ref, w_ref, *refs, has_bias):
    """One (tm, tn) output tile with K split across grid axis 2.

    x_ref: (tm, tk), w_ref: (tk, tn) [weight pre-transposed to K-major],
    optional b_ref: (1, tn), o_ref: (tm, tn), acc_ref: (tm, tn) f32 scratch.
    """
    if has_bias:
        b_ref, o_ref, acc_ref = refs
    else:
        o_ref, acc_ref = refs
        b_ref = None

    k = pl.program_id(2)

    @pl.when(k == 0)
    def _():
        acc_ref[...] = jnp.zeros_like(acc_ref)

    acc_ref[...] += jnp.dot(x_ref[...], w_ref[...],
                            preferred_element_type=jnp.float32)

    @pl.when(k == pl.num_programs(2) - 1)
    def _():
        r = acc_ref[...]
        if has_bias:
            r = r + b_ref[...].astype(jnp.float32)
        o_ref[...] = r.astype(o_ref.dtype)


def _linear_kernel_fullk(x_ref, w_ref, *refs, has_bias):
    """Whole-K tiles: no accumulator scratch, no init/finalize phases."""
    if has_bias:
        b_ref, o_ref = refs
    else:
        (o_ref,) = refs
        b_ref = None

    r = jnp.dot(x_ref[...], w_ref[...], preferred_element_type=jnp.float32)
    if has_bias:
        r = r + b_ref[...].astype(jnp.float32)
    o_ref[...] = r.astype(o_ref.dtype)


# ---------------------------------------------------------------------------
# Wrapper
# ---------------------------------------------------------------------------
# Tile working-set budget kept conservative so the same defaults fit v7x's
# 64 MiB VMEM (v5e/v6e have 128 MiB and are also fine).
_VMEM_TILE_BUDGET = 32 * 1024 * 1024
_VMEM_LIMIT_BYTES = 48 * 1024 * 1024


def _round_up(x, m):
    return ((x + m - 1) // m) * m


def _pick_div_tile(dim, candidates):
    # Prefer large 256-aligned tiles (v6e/v7x MXU is 256-wide); fall back to
    # the full extent, which is always a legal block size.
    for c in candidates:
        if dim >= c and dim % c == 0:
            return c
    return dim


def _tile_vmem_bytes(tm, tn, tk, k_steps, in_bytes, out_bytes, has_bias):
    b = 2 * (tm * tk + tk * tn) * in_bytes      # double-buffered x & w tiles
    b += 2 * tm * tn * out_bytes                # double-buffered out tile
    if k_steps > 1:
        b += tm * tn * 4                        # f32 accumulator scratch
    if has_bias:
        b += 2 * tn * 4                         # bias tile
    return b


@functools.partial(jax.jit, static_argnames=("tm", "tn", "tk", "compute_dtype"))
def qlinear_forward(x, weight, bias=None, *, tm=None, tn=None, tk=None,
                    compute_dtype=None):
    """Pallas implementation of QLinearLayer.forward: F.linear(x, weight, bias).

    x:      [..., K]   (f32 or bf16; bf16 runs the MXU at native rate)
    weight: [N, K]     (PyTorch nn.Linear layout)
    bias:   [N] or None
    returns [..., N] in x.dtype
    """
    orig_shape = x.shape
    K = orig_shape[-1]
    N, Kw = weight.shape
    assert Kw == K, "weight must be [out_features, in_features]"
    out_dtype = x.dtype

    cdt = jnp.dtype(compute_dtype) if compute_dtype is not None else jnp.dtype(x.dtype)
    x2d = x.reshape(-1, K).astype(cdt)
    # [K, N] weight layout: N on lanes, natural MXU LHSxRHS orientation.
    # (In production this transpose belongs with the offline quant()/reorder()
    # weight transforms, not the hot path.)
    w_kn = weight.T.astype(cdt)

    M = x2d.shape[0]
    in_bytes = cdt.itemsize
    out_bytes = jnp.dtype(out_dtype).itemsize
    has_bias = bias is not None

    # --- tile selection ----------------------------------------------------
    if tn is None:
        tn = _pick_div_tile(N, (512, 256, 128))
    if tk is None:
        tk = _pick_div_tile(K, (512, 256, 128))
    if tm is None:
        tm = 256
    tm = min(tm, _round_up(M, 8))
    k_steps = K // tk
    # Shrink the row tile until the double-buffered working set fits VMEM.
    while tm > 8 and _tile_vmem_bytes(tm, tn, tk, k_steps, in_bytes,
                                      out_bytes, has_bias) > _VMEM_TILE_BUDGET:
        tm //= 2
    tm = max(_round_up(tm, 8), 8)

    assert N % tn == 0 and K % tk == 0, "tn/tk must divide N/K"

    # Pad rows up to the row tile (costs at most one extra row-tile of work).
    M_pad = _round_up(M, tm)
    if M_pad != M:
        x2d = jnp.pad(x2d, ((0, M_pad - M), (0, 0)))

    grid_m, grid_n, grid_k = M_pad // tm, N // tn, K // tk

    # Note (v7x megacore): for large layers grid_m/grid_n > 1 so both
    # TensorCores get work; tiny layers degenerate to a single program.
    if grid_k == 1:
        kernel = functools.partial(_linear_kernel_fullk, has_bias=has_bias)
        grid = (grid_m, grid_n)
        in_specs = [
            pl.BlockSpec((tm, K), lambda i, j: (i, 0)),    # x row-tile, full K
            pl.BlockSpec((K, tn), lambda i, j: (0, j)),    # w[K,N] col-tile
        ]
        if has_bias:
            in_specs.append(pl.BlockSpec((1, tn), lambda i, j: (0, j)))
        out_spec = pl.BlockSpec((tm, tn), lambda i, j: (i, j))
        scratch = []
        dim_sem = ("parallel", "parallel")
    else:
        kernel = functools.partial(_linear_kernel_kacc, has_bias=has_bias)
        grid = (grid_m, grid_n, grid_k)
        in_specs = [
            pl.BlockSpec((tm, tk), lambda i, j, k: (i, k)),
            pl.BlockSpec((tk, tn), lambda i, j, k: (k, j)),
        ]
        if has_bias:
            in_specs.append(pl.BlockSpec((1, tn), lambda i, j, k: (0, j)))
        out_spec = pl.BlockSpec((tm, tn), lambda i, j, k: (i, j))
        scratch = [pltpu.VMEM((tm, tn), jnp.float32)]
        dim_sem = ("parallel", "parallel", "arbitrary")

    operands = [x2d, w_kn]
    if has_bias:
        operands.append(bias.reshape(1, N).astype(jnp.float32))

    out = pl.pallas_call(
        kernel,
        out_shape=jax.ShapeDtypeStruct((M_pad, N), out_dtype),
        grid_spec=pltpu.PrefetchScalarGridSpec(
            num_scalar_prefetch=0,
            grid=grid,
            in_specs=in_specs,
            out_specs=out_spec,
            scratch_shapes=scratch,
        ),
        compiler_params=pltpu.CompilerParams(
            dimension_semantics=dim_sem,
            vmem_limit_bytes=_VMEM_LIMIT_BYTES,
        ),
    )(*operands)

    if M_pad != M:
        out = out[:M]
    return out.reshape(*orig_shape[:-1], N)


# ---------------------------------------------------------------------------
# Self-test
# ---------------------------------------------------------------------------
if __name__ == "__main__":
    key = jax.random.PRNGKey(0)
    k1, k2, k3, k4, k5 = jax.random.split(key, 5)

    # Case 1: f32 inputs, bias, K fits in one tile (single-K kernel, no acc).
    batch, seq, in_features, out_features = 2, 8, 256, 512
    x = jax.random.normal(k1, (batch, seq, in_features), dtype=jnp.float32)
    w = jax.random.normal(k2, (out_features, in_features), dtype=jnp.float32) * 0.05
    b = jax.random.normal(k3, (out_features,), dtype=jnp.float32) * 0.1

    y = jax.block_until_ready(qlinear_forward(x, w, b))
    y_ref = jnp.einsum("bsk,nk->bsn", x, w,
                       precision=jax.lax.Precision.HIGHEST) + b
    assert y.shape == (batch, seq, out_features)
    assert jnp.allclose(y, y_ref, atol=2e-2, rtol=2e-2), "case 1 mismatch"

    # Case 2: bf16 inputs (MXU-native), no bias, ragged M (exercises padding)
    # and K split across the grid (exercises the accumulator kernel).
    batch2, seq2, in2, out2 = 2, 7, 1024, 384
    x2 = jax.random.normal(k4, (batch2, seq2, in2),
                           dtype=jnp.float32).astype(jnp.bfloat16)
    w2 = (jax.random.normal(k5, (out2, in2), dtype=jnp.float32)
          * 0.05).astype(jnp.bfloat16)

    y2 = jax.block_until_ready(qlinear_forward(x2, w2, None))
    y2_ref = jnp.einsum("bsk,nk->bsn",
                        x2.astype(jnp.float32), w2.astype(jnp.float32),
                        precision=jax.lax.Precision.HIGHEST)
    assert y2.shape == (batch2, seq2, out2)
    assert jnp.allclose(y2.astype(jnp.float32), y2_ref,
                        atol=5e-2, rtol=5e-2), "case 2 mismatch"

    print("KERNEL_OK")
</pallas_src>

<mosaic_0001>
module attributes {stable_mosaic.version = 11 : i64} {
  func.func @_linear_kernel_fullk(%arg0: i32, %arg1: i32, %arg2: memref<16x256xf32, #tpu.memory_space<vmem>>, %arg3: memref<256x512xf32, #tpu.memory_space<vmem>>, %arg4: memref<1x512xf32, #tpu.memory_space<vmem>>, %arg5: memref<16x512xf32, #tpu.memory_space<vmem>>) attributes {dimension_semantics = [#tpu.dimension_semantics<parallel>, #tpu.dimension_semantics<parallel>], iteration_bounds = array<i64: 1, 1>, scalar_prefetch = 0 : i64, scratch_operands = 0 : i64, tpu.core_type = #tpu.core_type<tc>, window_params = [{transform_indices = @transform_0, window_bounds = array<i64: 16, 256>}, {transform_indices = @transform_1, window_bounds = array<i64: 256, 512>}, {transform_indices = @transform_2, window_bounds = array<i64: 1, 512>}, {transform_indices = @transform_3, window_bounds = array<i64: 16, 512>}]} {
    %c0 = arith.constant 0 : index
    %c0_0 = arith.constant 0 : index
    %0 = vector.load %arg2[%c0, %c0_0] : memref<16x256xf32, #tpu.memory_space<vmem>>, vector<16x256xf32>
    %c0_1 = arith.constant 0 : index
    %c0_2 = arith.constant 0 : index
    %1 = vector.load %arg3[%c0_1, %c0_2] : memref<256x512xf32, #tpu.memory_space<vmem>>, vector<256x512xf32>
    %cst = arith.constant dense<0.000000e+00> : vector<16x512xf32>
    %2 = tpu.matmul %0, %1, %cst {dimension_numbers = #tpu.dot_dimension_numbers<[1], [0], [0], [1], [0, 0, 1, 1], [], []>} : vector<16x256xf32>, vector<256x512xf32>, vector<16x512xf32> -> vector<16x512xf32>
    %c0_3 = arith.constant 0 : index
    %c0_4 = arith.constant 0 : index
    %3 = vector.load %arg4[%c0_3, %c0_4] : memref<1x512xf32, #tpu.memory_space<vmem>>, vector<1x512xf32>
    %4 = vector.broadcast %3 : vector<1x512xf32> to vector<16x512xf32>
    %5 = arith.addf %2, %4 : vector<16x512xf32>
    %c0_5 = arith.constant 0 : index
    %c0_6 = arith.constant 0 : index
    %6 = vector.load %arg5[%c0_5, %c0_6] : memref<16x512xf32, #tpu.memory_space<vmem>>, vector<16x512xf32>
    tpu.vector_store %arg5[%c0_5, %c0_6], %5 {strides = array<i32>} : memref<16x512xf32, #tpu.memory_space<vmem>>, vector<16x512xf32>,
    return
  }
  func.func @transform_0(%arg0: i32, %arg1: i32) -> (i32, i32) {
    %c0_i32 = arith.constant 0 : i32
    %c0_i32_0 = arith.constant 0 : i32
    return %arg0, %c0_i32 : i32, i32
  }
  func.func @transform_1(%arg0: i32, %arg1: i32) -> (i32, i32) {
    %c0_i32 = arith.constant 0 : i32
    %c0_i32_0 = arith.constant 0 : i32
    return %c0_i32, %arg1 : i32, i32
  }
  func.func @transform_2(%arg0: i32, %arg1: i32) -> (i32, i32) {
    %c0_i32 = arith.constant 0 : i32
    %c0_i32_0 = arith.constant 0 : i32
    return %c0_i32, %arg1 : i32, i32
  }
  func.func @transform_3(%arg0: i32, %arg1: i32) -> (i32, i32) {
    %c0_i32 = arith.constant 0 : i32
    return %arg0, %arg1 : i32, i32
  }
}

</mosaic_0001>

<bundles_post_ra>
// kernel: qlinear_forward.1
= control target key start
LH: loop header
LB: loop body
LE: loop exit
PB: predicated region body
PF: predicated region fallthrough
CT: control target
= control target key end

     0   :  { %s839_s0 = inlined_call_operand.vmem [shape: f32[16,256], index: 0, kind: input, shape index: {}]   ;;  %s840_s1 = inlined_call_operand.vmem [shape: f32[256,512], index: 1, kind: input, shape index: {}]   ;;  %s841_s2 = inlined_call_operand.vmem [shape: f32[1,512], index: 2, kind: input, shape index: {}]   ;;  %s842_s3 = inlined_call_operand.hbm [shape: f32[16,512], index: 3, kind: output, shape index: {}]  }
   0x1   :  { %v80_v0 = vld [vmem:[%s840_s1 + $0x1e8] sm:$0xff]  ;;  %v79_v4 = vld [vmem:[%s840_s1 + $0x1e0] sm:$0xff]  ;;  %v82_v61 = vld [vmem:[%s840_s1 + $0x1f8] sm:$0xff] }
   0x2   :  { %v76_v1 = vld [vmem:[%s840_s1 + $0x1c8] sm:$0xff]  ;;  %203 = vmatpush.msra.mxu2 %v80_v0  ;;  %157 = vmatpush.msra.mxu0 %v79_v4  ;;  %v75_v7 = vld [vmem:[%s840_s1 + $0x1c0] sm:$0xff]  ;;  %v146_v62 = vld [vmem:[%s840_s1 + $0x3f8] sm:$0xff] }
   0x3   :  { %v144_v2 = vld [vmem:[%s840_s1 + $0x3e8] sm:$0xff]  ;;  %v143_v9 = vld [vmem:[%s840_s1 + $0x3e0] sm:$0xff] }
   0x4   :  { %226 = vmatpush.msra.mxu3 %v144_v2  ;;  %v140_v3 = vld [vmem:[%s840_s1 + $0x3c8] sm:$0xff]  ;;  %204 = vmatpush.msra.mxu2 %v76_v1  ;;  %v71_v11 = vld [vmem:[%s840_s1 + $0x1a0] sm:$0xff]  ;;  %v78_v1 = vld [vmem:[%s840_s1 + $0x1d8] sm:$0xff] }
   0x5   :  { %v72_v5 = vld [vmem:[%s840_s1 + $0x1a8] sm:$0xff]  ;;  %158 = vmatpush.msra.mxu0 %v75_v7  ;;  %180 = vmatpush.msra.mxu1 %v143_v9  ;;  %v139_v12 = vld [vmem:[%s840_s1 + $0x3c0] sm:$0xff]  ;;  %v142_v2 = vld [vmem:[%s840_s1 + $0x3d8] sm:$0xff] }
   0x6   :  { %v136_v6 = vld [vmem:[%s840_s1 + $0x3a8] sm:$0xff]  ;;  %227 = vmatpush.msra.mxu3 %v140_v3  ;;  %205 = vmatpush.msra.mxu2 %v72_v5  ;;  %v67_v13 = vld [vmem:[%s840_s1 + $0x180] sm:$0xff]  ;;  %v81_v3 = vld [vmem:[%s840_s1 + $0x1f0] sm:$0xff] }
   0x7   :  { %v68_v8 = vld [vmem:[%s840_s1 + $0x188] sm:$0xff]  ;;  %v135_v14 = vld [vmem:[%s840_s1 + $0x3a0] sm:$0xff]  ;;  %159 = vmatpush.msra.mxu0 %v71_v11  ;;  %181 = vmatpush.msra.mxu1 %v139_v12  ;;  %v74_v5 = vld [vmem:[%s840_s1 + $0x1b8] sm:$0xff] }
   0x8   :  { %v132_v10 = vld [vmem:[%s840_s1 + $0x388] sm:$0xff]  ;;  %228 = vmatpush.msra.mxu3 %v136_v6  ;;  %206 = vmatpush.msra.mxu2 %v68_v8  ;;  %v63_v17 = vld [vmem:[%s840_s1 + $0x160] sm:$0xff]  ;;  %v138_v6 = vld [vmem:[%s840_s1 + $0x3b8] sm:$0xff] }
   0x9   :  { %v64_v15 = vld [vmem:[%s840_s1 + $0x168] sm:$0xff]  ;;  %v131_v18 = vld [vmem:[%s840_s1 + $0x380] sm:$0xff]  ;;  %160 = vmatpush.msra.mxu0 %v67_v13  ;;  %182 = vmatpush.msra.mxu1 %v135_v14  ;;  %v77_v7 = vld [vmem:[%s840_s1 + $0x1d0] sm:$0xff] }
   0xa   :  { %v128_v16 = vld [vmem:[%s840_s1 + $0x368] sm:$0xff]  ;;  %229 = vmatpush.msra.mxu3 %v132_v10  ;;  %207 = vmatpush.msra.mxu2 %v64_v15  ;;  %v59_v21 = vld [vmem:[%s840_s1 + $0x140] sm:$0xff]  ;;  %v145_v8 = vld [vmem:[%s840_s1 + $0x3f0] sm:$0xff] }
   0xb   :  { %v60_v19 = vld [vmem:[%s840_s1 + $0x148] sm:$0xff]  ;;  %v127_v22 = vld [vmem:[%s840_s1 + $0x360] sm:$0xff]  ;;  %161 = vmatpush.msra.mxu0 %v63_v17  ;;  %183 = vmatpush.msra.mxu1 %v131_v18  ;;  %v70_v9 = vld [vmem:[%s840_s1 + $0x198] sm:$0xff] }
   0xc   :  { %v124_v20 = vld [vmem:[%s840_s1 + $0x348] sm:$0xff]  ;;  %230 = vmatpush.msra.mxu3 %v128_v16  ;;  %208 = vmatpush.msra.mxu2 %v60_v19  ;;  %v55_v25 = vld [vmem:[%s840_s1 + $0x120] sm:$0xff]  ;;  %v134_v10 = vld [vmem:[%s840_s1 + $0x398] sm:$0xff] }
   0xd   :  { %v56_v23 = vld [vmem:[%s840_s1 + $0x128] sm:$0xff]  ;;  %v123_v26 = vld [vmem:[%s840_s1 + $0x340] sm:$0xff]  ;;  %162 = vmatpush.msra.mxu0 %v59_v21  ;;  %184 = vmatpush.msra.mxu1 %v127_v22  ;;  %v73_v11 = vld [vmem:[%s840_s1 + $0x1b0] sm:$0xff] }
   0xe   :  { %v120_v24 = vld [vmem:[%s840_s1 + $0x328] sm:$0xff]  ;;  %231 = vmatpush.msra.mxu3 %v124_v20  ;;  %209 = vmatpush.msra.mxu2 %v56_v23  ;;  %v51_v29 = vld [vmem:[%s840_s1 + $0x100] sm:$0xff]  ;;  %v141_v12 = vld [vmem:[%s840_s1 + $0x3d0] sm:$0xff] }
   0xf   :  { %v52_v27 = vld [vmem:[%s840_s1 + $0x108] sm:$0xff]  ;;  %v119_v30 = vld [vmem:[%s840_s1 + $0x320] sm:$0xff]  ;;  %163 = vmatpush.msra.mxu0 %v55_v25  ;;  %185 = vmatpush.msra.mxu1 %v123_v26  ;;  %v66_v13 = vld [vmem:[%s840_s1 + $0x178] sm:$0xff] }
  0x10   :  { %v116_v28 = vld [vmem:[%s840_s1 + $0x308] sm:$0xff]  ;;  %232 = vmatpush.msra.mxu3 %v120_v24  ;;  %210 = vmatpush.msra.mxu2 %v52_v27  ;;  %v47_v33 = vld [vmem:[%s840_s1 + $0xe0] sm:$0xff]  ;;  %v130_v14 = vld [vmem:[%s840_s1 + $0x378] sm:$0xff] }
  0x11   :  { %v48_v31 = vld [vmem:[%s840_s1 + $0xe8] sm:$0xff]  ;;  %v115_v34 = vld [vmem:[%s840_s1 + $0x300] sm:$0xff]  ;;  %164 = vmatpush.msra.mxu0 %v51_v29  ;;  %186 = vmatpush.msra.mxu1 %v119_v30  ;;  %v69_v15 = vld [vmem:[%s840_s1 + $0x190] sm:$0xff] }
  0x12   :  { %v112_v32 = vld [vmem:[%s840_s1 + $0x2e8] sm:$0xff]  ;;  %233 = vmatpush.msra.mxu3 %v116_v28  ;;  %211 = vmatpush.msra.mxu2 %v48_v31  ;;  %v43_v37 = vld [vmem:[%s840_s1 + $0xc0] sm:$0xff]  ;;  %v137_v16 = vld [vmem:[%s840_s1 + $0x3b0] sm:$0xff] }
  0x13   :  { %v44_v35 = vld [vmem:[%s840_s1 + $0xc8] sm:$0xff]  ;;  %v111_v38 = vld [vmem:[%s840_s1 + $0x2e0] sm:$0xff]  ;;  %165 = vmatpush.msra.mxu0 %v47_v33  ;;  %187 = vmatpush.msra.mxu1 %v115_v34  ;;  %v62_v17 = vld [vmem:[%s840_s1 + $0x158] sm:$0xff] }
  0x14   :  { %v108_v36 = vld [vmem:[%s840_s1 + $0x2c8] sm:$0xff]  ;;  %234 = vmatpush.msra.mxu3 %v112_v32  ;;  %212 = vmatpush.msra.mxu2 %v44_v35  ;;  %v39_v41 = vld [vmem:[%s840_s1 + $0xa0] sm:$0xff]  ;;  %v126_v18 = vld [vmem:[%s840_s1 + $0x358] sm:$0xff] }
  0x15   :  { %v40_v39 = vld [vmem:[%s840_s1 + $0xa8] sm:$0xff]  ;;  %v107_v42 = vld [vmem:[%s840_s1 + $0x2c0] sm:$0xff]  ;;  %166 = vmatpush.msra.mxu0 %v43_v37  ;;  %188 = vmatpush.msra.mxu1 %v111_v38  ;;  %v65_v19 = vld [vmem:[%s840_s1 + $0x170] sm:$0xff] }
  0x16   :  { %v104_v40 = vld [vmem:[%s840_s1 + $0x2a8] sm:$0xff]  ;;  %235 = vmatpush.msra.mxu3 %v108_v36  ;;  %213 = vmatpush.msra.mxu2 %v40_v39  ;;  %v35_v45 = vld [vmem:[%s840_s1 + $0x80] sm:$0xff]  ;;  %v133_v20 = vld [vmem:[%s840_s1 + $0x390] sm:$0xff] }
  0x17   :  { %v36_v43 = vld [vmem:[%s840_s1 + $0x88] sm:$0xff]  ;;  %v103_v46 = vld [vmem:[%s840_s1 + $0x2a0] sm:$0xff]  ;;  %167 = vmatpush.msra.mxu0 %v39_v41  ;;  %189 = vmatpush.msra.mxu1 %v107_v42  ;;  %v58_v21 = vld [vmem:[%s840_s1 + $0x138] sm:$0xff] }
  0x18   :  { %v100_v44 = vld [vmem:[%s840_s1 + $0x288] sm:$0xff]  ;;  %236 = vmatpush.msra.mxu3 %v104_v40  ;;  %214 = vmatpush.msra.mxu2 %v36_v43  ;;  %v31_v49 = vld [vmem:[%s840_s1 + $0x60] sm:$0xff]  ;;  %v122_v22 = vld [vmem:[%s840_s1 + $0x338] sm:$0xff] }
  0x19   :  { %v32_v47 = vld [vmem:[%s840_s1 + $0x68] sm:$0xff]  ;;  %v99_v50 = vld [vmem:[%s840_s1 + $0x280] sm:$0xff]  ;;  %168 = vmatpush.msra.mxu0 %v35_v45  ;;  %190 = vmatpush.msra.mxu1 %v103_v46  ;;  %v61_v24 = vld [vmem:[%s840_s1 + $0x150] sm:$0xff] }
  0x1a   :  { %v96_v48 = vld [vmem:[%s840_s1 + $0x268] sm:$0xff]  ;;  %237 = vmatpush.msra.mxu3 %v100_v44  ;;  %215 = vmatpush.msra.mxu2 %v32_v47  ;;  %v27_v53 = vld [vmem:[%s840_s1 + $0x40] sm:$0xff]  ;;  %v54_v25 = vld [vmem:[%s840_s1 + $0x118] sm:$0xff] }
  0x1b   :  { %v28_v51 = vld [vmem:[%s840_s1 + $0x48] sm:$0xff]  ;;  %v95_v54 = vld [vmem:[%s840_s1 + $0x260] sm:$0xff]  ;;  %169 = vmatpush.msra.mxu0 %v31_v49  ;;  %191 = vmatpush.msra.mxu1 %v99_v50  ;;  %v129_v26 = vld [vmem:[%s840_s1 + $0x370] sm:$0xff] }
  0x1c   :  { %v92_v52 = vld [vmem:[%s840_s1 + $0x248] sm:$0xff]  ;;  %238 = vmatpush.msra.mxu3 %v96_v48  ;;  %216 = vmatpush.msra.mxu2 %v28_v51  ;;  %v23_v57 = vld [vmem:[%s840_s1 + $0x20] sm:$0xff]  ;;  %v118_v27 = vld [vmem:[%s840_s1 + $0x318] sm:$0xff] }
  0x1d   :  { %v24_v55 = vld [vmem:[%s840_s1 + $0x28] sm:$0xff]  ;;  %v91_v58 = vld [vmem:[%s840_s1 + $0x240] sm:$0xff]  ;;  %170 = vmatpush.msra.mxu0 %v27_v53  ;;  %192 = vmatpush.msra.mxu1 %v95_v54  ;;  %v57_v28 = vld [vmem:[%s840_s1 + $0x130] sm:$0xff] }
  0x1e   :  { %v88_v56 = vld [vmem:[%s840_s1 + $0x228] sm:$0xff]  ;;  %239 = vmatpush.msra.mxu3 %v92_v52  ;;  %217 = vmatpush.msra.mxu2 %v24_v55  ;;  %v19_v63 = vld [vmem:[%s840_s1] sm:$0xff] }
  0x1f   :  { %v20_v59 = vld [vmem:[%s840_s1 + $0x8] sm:$0xff]  ;;  %171 = vmatpush.msra.mxu0 %v23_v57  ;;  %193 = vmatpush.msra.mxu1 %v91_v58  ;;  %v87_v0 = vld [vmem:[%s840_s1 + $0x220] sm:$0xff] }
  0x20   :  { %v84_v60 = vld [vmem:[%s840_s1 + $0x208] sm:$0xff]  ;;  %240 = vmatpush.msra.mxu3 %v88_v56  ;;  %218 = vmatpush.msra.mxu2 %v20_v59  ;;  %v83_v4 = vld [vmem:[%s840_s1 + $0x200] sm:$0xff] }
  0x21   :  { %172 = vmatpush.msra.mxu0 %v19_v63  ;;  %194 = vmatpush.msra.mxu1 %v87_v0  ;;  %v683_v23 = vld [vmem:[%s839_s0] sm:$0xff] }
  0x22   :  { %241 = vmatpush.msra.mxu3 %v84_v60  ;;  %295 = vmatpush.msrb.mxu2 %v82_v61 }
  0x23   :  { %249 = vmatpush.msrb.mxu0 %v81_v3  ;;  %195 = vmatpush.msra.mxu1 %v83_v4 }
  0x24   :  { %318 = vmatpush.msrb.mxu3 %v146_v62  ;;  %296 = vmatpush.msrb.mxu2 %v78_v1 }
  0x25   :  { %250 = vmatpush.msrb.mxu0 %v77_v7  ;;  %272 = vmatpush.msrb.mxu1 %v145_v8 }
  0x26   :  { %319 = vmatpush.msrb.mxu3 %v142_v2  ;;  %297 = vmatpush.msrb.mxu2 %v74_v5 }
  0x27   :  { %251 = vmatpush.msrb.mxu0 %v73_v11  ;;  %273 = vmatpush.msrb.mxu1 %v141_v12 }
  0x28   :  { %320 = vmatpush.msrb.mxu3 %v138_v6  ;;  %298 = vmatpush.msrb.mxu2 %v70_v9 }
  0x29   :  { %252 = vmatpush.msrb.mxu0 %v69_v15  ;;  %274 = vmatpush.msrb.mxu1 %v137_v16 }
  0x2a   :  { %321 = vmatpush.msrb.mxu3 %v134_v10  ;;  %299 = vmatpush.msrb.mxu2 %v66_v13 }
  0x2b   :  { %253 = vmatpush.msrb.mxu0 %v65_v19  ;;  %275 = vmatpush.msrb.mxu1 %v133_v20 }
  0x2c   :  { %322 = vmatpush.msrb.mxu3 %v130_v14  ;;  %300 = vmatpush.msrb.mxu2 %v62_v17 }
  0x2e   :  { %323 = vmatpush.msrb.mxu3 %v126_v18  ;;  %301 = vmatpush.msrb.mxu2 %v58_v21 }
  0x30   :  { %324 = vmatpush.msrb.mxu3 %v122_v22 }
  0x31   :  { %8 = vsyncpa [#allocation3], 0  ;;  %219 = vmatmul.f32.vlgmr.msra.gmra.mxu2 %v683_v23  ;;  %254 = vmatpush.msrb.mxu0 %v61_v24  ;;  %v50_v29 = vld [vmem:[%s840_s1 + $0xf8] sm:$0xff]  ;;  %v707_v30 = vld [vmem:[%s839_s0 + $0x8] sm:$0xff]  ;;  %s355_s8 = sshll.u32 %s842_s3, 4  ;;  %s397_s9 = smov 512   ;;  %s356_s8 = int_to_ptr.hbm [resolvable:$true] %s355_s8 }
  0x32   :  { %302 = vmatpush.msrb.mxu2 %v54_v25  ;;  %276 = vmatpush.msrb.mxu1 %v129_v26  ;;  %v125_v31 = vld [vmem:[%s840_s1 + $0x350] sm:$0xff]  ;;  %v114_v32 = vld [vmem:[%s840_s1 + $0x2f8] sm:$0xff]  ;;  %v147_v4 = vld [vmem:[%s841_s2] sm:$0xf]  ;;  %s398_s10 = smov 32  }
  0x33   :  { %325 = vmatpush.msrb.mxu3 %v118_v27  ;;  %255 = vmatpush.msrb.mxu0 %v57_v28  ;;  %v46_v33 = vld [vmem:[%s840_s1 + $0xd8] sm:$0xff]  ;;  %v53_v34 = vld [vmem:[%s840_s1 + $0x110] sm:$0xff]  ;;  %v150_v5 = vperm.slane %v147_v4, 1  ;;  %v149_v6 = vperm.slane %v147_v4, 0  ;;  %v152_v24 = vperm.slane %v147_v4, 3 }
  0x34   :  { %303 = vmatpush.msrb.mxu2 %v50_v29  ;;  %242 = vmatmul.f32.vlgmr.msra.gmra.mxu3 %v707_v30  ;;  %v121_v35 = vld [vmem:[%s840_s1 + $0x330] sm:$0xff]  ;;  %v110_v36 = vld [vmem:[%s840_s1 + $0x2d8] sm:$0xff] }
  0x35   :  { %277 = vmatpush.msrb.mxu1 %v125_v31  ;;  %326 = vmatpush.msrb.mxu3 %v114_v32  ;;  %v42_v37 = vld [vmem:[%s840_s1 + $0xb8] sm:$0xff]  ;;  %v49_v38 = vld [vmem:[%s840_s1 + $0xf0] sm:$0xff] }
  0x36   :  { %304 = vmatpush.msrb.mxu2 %v46_v33  ;;  %256 = vmatpush.msrb.mxu0 %v53_v34  ;;  %v117_v39 = vld [vmem:[%s840_s1 + $0x310] sm:$0xff]  ;;  %v38_v40 = vld [vmem:[%s840_s1 + $0x98] sm:$0xff] }
  0x37   :  { %278 = vmatpush.msrb.mxu1 %v121_v35  ;;  %327 = vmatpush.msrb.mxu3 %v110_v36  ;;  %v106_v41 = vld [vmem:[%s840_s1 + $0x2b8] sm:$0xff]  ;;  %v747_v42 = vld [vmem:[%s839_s0 + $0x10] sm:$0xff] }
  0x38   :  { %305 = vmatpush.msrb.mxu2 %v42_v37  ;;  %173 = vmatmul.f32.vlgmr.msra.gmra.mxu0 %v683_v23  ;;  %v45_v43 = vld [vmem:[%s840_s1 + $0xd0] sm:$0xff]  ;;  %v34_v45 = vld [vmem:[%s840_s1 + $0x78] sm:$0xff] }
  0x39   :  { %257 = vmatpush.msrb.mxu0 %v49_v38  ;;  %279 = vmatpush.msrb.mxu1 %v117_v39  ;;  %v113_v44 = vld [vmem:[%s840_s1 + $0x2f0] sm:$0xff]  ;;  %v102_v46 = vld [vmem:[%s840_s1 + $0x298] sm:$0xff] }
  0x3a   :  { %306 = vmatpush.msrb.mxu2 %v38_v40  ;;  %328 = vmatpush.msrb.mxu3 %v106_v41  ;;  %v18_v47 = vld [vmem:[%s839_s0 + $0x18] sm:$0xff]  ;;  %v41_v48 = vld [vmem:[%s840_s1 + $0xb0] sm:$0xff] }
  0x3b   :  { %196 = vmatmul.f32.vlgmr.msra.gmra.mxu1 %v707_v30  ;;  %222 = vmatmul.f32.gmra.mxu2 %v747_v42  ;;  %v109_v49 = vld [vmem:[%s840_s1 + $0x2d0] sm:$0xff]  ;;  %v30_v50 = vld [vmem:[%s840_s1 + $0x58] sm:$0xff] }
  0x3c   :  { %258 = vmatpush.msrb.mxu0 %v45_v43  ;;  %280 = vmatpush.msrb.mxu1 %v113_v44  ;;  %v98_v51 = vld [vmem:[%s840_s1 + $0x278] sm:$0xff]  ;;  %v37_v52 = vld [vmem:[%s840_s1 + $0x90] sm:$0xff] }
  0x3d   :  { %307 = vmatpush.msrb.mxu2 %v34_v45  ;;  %329 = vmatpush.msrb.mxu3 %v102_v46  ;;  %v105_v53 = vld [vmem:[%s840_s1 + $0x2b0] sm:$0xff]  ;;  %v26_v54 = vld [vmem:[%s840_s1 + $0x38] sm:$0xff] }
  0x3e   :  { %245 = vmatmul.f32.gmra.mxu3 %v18_v47  ;;  %259 = vmatpush.msrb.mxu0 %v41_v48  ;;  %v94_v55 = vld [vmem:[%s840_s1 + $0x258] sm:$0xff]  ;;  %v33_v56 = vld [vmem:[%s840_s1 + $0x70] sm:$0xff] }
  0x3f   :  { %281 = vmatpush.msrb.mxu1 %v109_v49  ;;  %308 = vmatpush.msrb.mxu2 %v30_v50  ;;  %v101_v57 = vld [vmem:[%s840_s1 + $0x290] sm:$0xff]  ;;  %v22_v58 = vld [vmem:[%s840_s1 + $0x18] sm:$0xff] }
  0x40   :  { %330 = vmatpush.msrb.mxu3 %v98_v51  ;;  %260 = vmatpush.msrb.mxu0 %v37_v52  ;;  %v90_v59 = vld [vmem:[%s840_s1 + $0x238] sm:$0xff]  ;;  %v29_v60 = vld [vmem:[%s840_s1 + $0x50] sm:$0xff] }
  0x41   :  { %282 = vmatpush.msrb.mxu1 %v105_v53  ;;  %309 = vmatpush.msrb.mxu2 %v26_v54  ;;  %v97_v61 = vld [vmem:[%s840_s1 + $0x270] sm:$0xff]  ;;  %v86_v62 = vld [vmem:[%s840_s1 + $0x218] sm:$0xff] }
  0x42   :  { %331 = vmatpush.msrb.mxu3 %v94_v55  ;;  %176 = vmatmul.f32.gmra.mxu0 %v747_v42  ;;  %v25_v63 = vld [vmem:[%s840_s1 + $0x30] sm:$0xff] }
  0x43   :  { %261 = vmatpush.msrb.mxu0 %v33_v56  ;;  %283 = vmatpush.msrb.mxu1 %v101_v57  ;;  %v93_v0 = vld [vmem:[%s840_s1 + $0x250] sm:$0xff] }
  0x44   :  { %310 = vmatpush.msrb.mxu2 %v22_v58  ;;  %332 = vmatpush.msrb.mxu3 %v90_v59  ;;  %v21_v1 = vld [vmem:[%s840_s1 + $0x10] sm:$0xff] }
  0x45   :  { %199 = vmatmul.f32.gmra.mxu1 %v18_v47  ;;  %311 = vmatmul.f32.vlgmr.msrb.gmra.mxu2 %v683_v23  ;;  %v89_v2 = vld [vmem:[%s840_s1 + $0x230] sm:$0xff] }
  0x46   :  { %262 = vmatpush.msrb.mxu0 %v29_v60  ;;  %284 = vmatpush.msrb.mxu1 %v97_v61  ;;  %v85_v3 = vld [vmem:[%s840_s1 + $0x210] sm:$0xff]  ;;  %s396_s1 = smov [#allocation2]  }
  0x47   :  { %333 = vmatpush.msrb.mxu3 %v86_v62  ;;  %s353_s2 = sshll.u32 %s396_s1, 4  ;;  %s354_s2 = int_to_ptr.vmem [resolvable:$true] %s353_s2 }
  0x48   :  { %334 = vmatmul.f32.vlgmr.msrb.gmra.mxu3 %v707_v30  ;;  %263 = vmatpush.msrb.mxu0 %v25_v63 }
  0x49   :  { %285 = vmatpush.msrb.mxu1 %v93_v0 }
  0x4a   :  { %264 = vmatpush.msrb.mxu0 %v21_v1 }
  0x4b   :  { %286 = vmatpush.msrb.mxu1 %v89_v2  ;;  %265 = vmatmul.f32.vlgmr.msrb.gmra.mxu0 %v683_v23  ;;  %v151_v23 = vperm.slane %v147_v4, 2 }
  0x4d   :  { %287 = vmatpush.msrb.mxu1 %v85_v3  ;;  %314 = vmatmul.f32.gmra.mxu2 %v747_v42 }
  0x4e   :  { %288 = vmatmul.f32.vlgmr.msrb.gmra.mxu1 %v707_v30 }
  0x50   :  { %337 = vmatmul.f32.gmra.mxu3 %v18_v47 }
  0x53   :  { %268 = vmatmul.f32.gmra.mxu0 %v747_v42 }
  0x56   :  { %291 = vmatmul.f32.gmra.mxu1 %v18_v47 }
  0xb4   :  { %v220_v7 = vpop.f32.mrf.mxu2 }
  0xb5   :  { %v174_v8 = vpop.f32.mrf.mxu0  ;;  %v221_v9 = vadd.f32 %v220_v7, %v150_v5 }
  0xb6   :  { %v175_v10 = vadd.f32 %v174_v8, %v149_v6 }
  0xb7   :  { %v243_v11 = vpop.f32.mrf.mxu3 }
  0xb8   :  { %v197_v12 = vpop.f32.mrf.mxu1  ;;  %v244_v13 = vadd.f32 %v243_v11, %v221_v9 }
  0xb9   :  { %v198_v14 = vadd.f32 %v197_v12, %v175_v10 }
  0xba   :  { %342 = vst [vmem:[#allocation2 + $0x8] sm:$0xff] %v244_v13 }
  0xbb   :  { %341 = vst [vmem:[#allocation2] sm:$0xff] %v198_v14 }
  0xbe   :  { %v223_v15 = vpop.f32.mrf.mxu2 }
  0xbf   :  { %v177_v16 = vpop.f32.mrf.mxu0  ;;  %v224_v17 = vadd.f32 %v223_v15, %v150_v5 }
  0xc0   :  { %v178_v18 = vadd.f32 %v177_v16, %v149_v6 }
  0xc1   :  { %v246_v19 = vpop.f32.mrf.mxu3 }
  0xc2   :  { %v200_v20 = vpop.f32.mrf.mxu1  ;;  %v247_v21 = vadd.f32 %v246_v19, %v224_v17 }
  0xc3   :  { %v201_v22 = vadd.f32 %v200_v20, %v178_v18 }
  0xc4   :  { %346 = vst [vmem:[#allocation2 + $0x28] sm:$0xff] %v247_v21 }
  0xc5   :  { %345 = vst [vmem:[#allocation2 + $0x20] sm:$0xff] %v201_v22 }
  0xc8   :  { %v266_v25 = vpop.f32.mrf.mxu0  ;;  %v312_v26 = vpop.f32.mrf.mxu2 }
  0xc9   :  { %v267_v27 = vadd.f32 %v266_v25, %v151_v23  ;;  %v313_v28 = vadd.f32 %v312_v26, %v152_v24 }
  0xcb   :  { %v289_v29 = vpop.f32.mrf.mxu1  ;;  %v335_v30 = vpop.f32.mrf.mxu3 }
  0xcc   :  { %v290_v31 = vadd.f32 %v289_v29, %v267_v27  ;;  %v336_v32 = vadd.f32 %v335_v30, %v313_v28 }
  0xce   :  { %343 = vst [vmem:[#allocation2 + $0x10] sm:$0xff] %v290_v31 }
  0xcf   :  { %344 = vst [vmem:[#allocation2 + $0x18] sm:$0xff] %v336_v32 }
  0xd0   :  { %v269_v33 = vpop.f32.mrf.mxu0  ;;  %v315_v34 = vpop.f32.mrf.mxu2 }
  0xd1   :  { %v270_v35 = vadd.f32 %v269_v33, %v151_v23  ;;  %v316_v36 = vadd.f32 %v315_v34, %v152_v24 }
  0xd3   :  { %v292_v37 = vpop.f32.mrf.mxu1  ;;  %v338_v38 = vpop.f32.mrf.mxu3 }
  0xd4   :  { %v293_v39 = vadd.f32 %v292_v37, %v270_v35  ;;  %v339_v40 = vadd.f32 %v338_v38, %v316_v36 }
  0xd6   :  { %347 = vst [vmem:[#allocation2 + $0x30] sm:$0xff] %v293_v39 }
  0xd7   :  { %348 = vst [vmem:[#allocation2 + $0x38] sm:$0xff] %v339_v40 }
  0xd8   :  { %361 = dma.vmem_to_hbm [thread:$0]  %s354_s2, 1024, %s356_s8, [#allocation3], %s397_s9, %s397_s9, %s398_s10  }
  0xd9   :  { %394 = dma.done.wait [#allocation3], 1024  }
  0xda   :  { %395 = vsyncadd [#allocation3], 4294966272 }
  0xdb   :  { %366 = vsyncpa [#allocation3], 1 }

</bundles_post_ra>
